<compile_context>
chip_gen: v7x
topology: tpu7x:2x2x1
jax: 0.10.0
libtpu: 0.0.40
codegen_flags: <defaults>
</compile_context>

<pallas_src>
import math
import functools

import jax
import jax.numpy as jnp
from jax import lax
from jax.experimental import pallas as pl
from jax.experimental.pallas import tpu as pltpu


def _mha_kernel(x_ref, g_ref, beta_ref,
                w_in_ref, b_in_ref,
                w_out_ref, b_out_ref,
                o_ref,
                concat_ref,
                *, num_heads, head_dim, eps):
    # x_ref: (S, E) tile for the current batch element.
    S, E = x_ref.shape
    x = x_ref[...].astype(jnp.float32)

    # ---- LayerNorm over last dim (f32 elementwise) ----
    mean = jnp.mean(x, axis=-1, keepdims=True)
    var = jnp.mean(jnp.square(x - mean), axis=-1, keepdims=True)
    xn = (x - mean) * lax.rsqrt(var + eps)
    xn = xn * g_ref[...] + beta_ref[...]

    # ---- Fused QKV projection: one lane-dense (S,E)@(E,3E) matmul ----
    # bf16 MXU operands, f32 accumulation; single lane-dense bias add.
    qkv = jnp.dot(xn.astype(jnp.bfloat16), w_in_ref[...],
                  preferred_element_type=jnp.float32) + b_in_ref[...]   # (S, 3E) f32

    scale = 1.0 / math.sqrt(head_dim)

    # ---- Per-head attention; each head writes its (S, Dh) slab into the concat scratch ----
    for h in range(num_heads):
        q = qkv[:, h * head_dim:(h + 1) * head_dim]
        k = qkv[:, E + h * head_dim:E + (h + 1) * head_dim]
        v = qkv[:, 2 * E + h * head_dim:2 * E + (h + 1) * head_dim]

        # scores = q @ k^T (contract on head_dim), scaled; f32 accumulate
        s = lax.dot_general(q.astype(jnp.bfloat16), k.astype(jnp.bfloat16),
                            (((1,), (1,)), ((), ())),
                            preferred_element_type=jnp.float32) * scale   # (S, S)

        # numerically-stable softmax over keys (f32); reciprocal goes to the EUP slot
        s = s - jnp.max(s, axis=-1, keepdims=True)
        p = jnp.exp(s)
        p = p * pl.reciprocal(jnp.sum(p, axis=-1, keepdims=True), approx=True)

        ah = jnp.dot(p.astype(jnp.bfloat16), v.astype(jnp.bfloat16),
                     preferred_element_type=jnp.float32)                  # (S, Dh)
        concat_ref[:, h * head_dim:(h + 1) * head_dim] = ah

    # ---- Single output projection (S,E)@(E,E) + bias ----
    out = jnp.dot(concat_ref[...].astype(jnp.bfloat16), w_out_ref[...],
                  preferred_element_type=jnp.float32) + b_out_ref[...]
    o_ref[...] = out.astype(o_ref.dtype)


def multihead_attention_pallas(x, params, *, num_heads, eps=1e-5):
    """x: (B, S, E) float32. params: dict with gamma, beta, w_in, b_in, w_out, b_out."""
    B, S, E = x.shape
    Dh = E // num_heads
    gamma, beta = params["gamma"], params["beta"]
    w_in, b_in = params["w_in"], params["b_in"]          # (3E, E), (3E,)
    w_out, b_out = params["w_out"], params["b_out"]      # (E, E), (E,)

    # Pre-transpose once; cast MXU weight operands to bf16 (halves HBM traffic too).
    w_in_t = jnp.transpose(w_in).astype(jnp.bfloat16)        # (E, 3E)
    w_out_t = jnp.transpose(w_out).astype(jnp.bfloat16)      # (E, E)
    b_in_2d = b_in.reshape(1, 3 * E).astype(jnp.float32)     # lane-dense bias
    b_out_2d = b_out.reshape(1, E).astype(jnp.float32)
    gamma_2d = gamma.reshape(1, E).astype(jnp.float32)
    beta_2d = beta.reshape(1, E).astype(jnp.float32)

    kernel = functools.partial(_mha_kernel, num_heads=num_heads, head_dim=Dh, eps=eps)

    full2d = lambda shape: pl.BlockSpec(shape, lambda b: (0, 0))

    return pl.pallas_call(
        kernel,
        out_shape=jax.ShapeDtypeStruct((B, S, E), x.dtype),
        grid_spec=pltpu.PrefetchScalarGridSpec(
            num_scalar_prefetch=0,
            grid=(B,),
            in_specs=[
                pl.BlockSpec((None, S, E), lambda b: (b, 0, 0)),   # x (per-batch tile)
                full2d((1, E)),            # gamma
                full2d((1, E)),            # beta
                full2d((E, 3 * E)),        # W_in^T  (bf16, fused Q|K|V)
                full2d((1, 3 * E)),        # b_in    (lane-dense)
                full2d((E, E)),            # W_out^T (bf16)
                full2d((1, E)),            # b_out
            ],
            out_specs=pl.BlockSpec((None, S, E), lambda b: (b, 0, 0)),
            scratch_shapes=[pltpu.VMEM((S, E), jnp.float32)],      # per-head concat buffer
        ),
        compiler_params=pltpu.CompilerParams(
            dimension_semantics=("parallel",)),
        # TODO(synk): for large S add flash-style key tiling + online softmax (required for
        # v7x's 64 MiB VMEM) and raise vmem_limit_bytes on v5e; unnecessary at these sizes.
    )(x, gamma_2d, beta_2d, w_in_t, b_in_2d, w_out_t, b_out_2d)


def multihead_attention_ref(x, params, *, num_heads, eps=1e-5):
    """Pure-JAX f32 reference matching PyTorch LayerNorm + nn.MultiheadAttention."""
    B, S, E = x.shape
    Dh = E // num_heads
    gamma, beta = params["gamma"], params["beta"]
    w_in, b_in = params["w_in"], params["b_in"]
    w_out, b_out = params["w_out"], params["b_out"]

    mean = x.mean(-1, keepdims=True)
    var = ((x - mean) ** 2).mean(-1, keepdims=True)
    xn = (x - mean) / jnp.sqrt(var + eps) * gamma + beta

    qkv = xn @ w_in.T + b_in                      # (B, S, 3E)
    q, k, v = jnp.split(qkv, 3, axis=-1)
    def heads(t):
        return t.reshape(B, S, num_heads, Dh).transpose(0, 2, 1, 3)  # (B, H, S, Dh)
    q, k, v = heads(q), heads(k), heads(v)
    s = jnp.einsum("bhqd,bhkd->bhqk", q, k) / math.sqrt(Dh)
    p = jax.nn.softmax(s, axis=-1)
    o = jnp.einsum("bhqk,bhkd->bhqd", p, v)
    o = o.transpose(0, 2, 1, 3).reshape(B, S, E)
    return o @ w_out.T + b_out


if __name__ == "__main__":
    B, S, E, H = 2, 8, 128, 4   # emb_dim=128, num_heads=4, seq=8, batch=2

    key = jax.random.PRNGKey(0)
    ks = jax.random.split(key, 7)
    params = {
        "gamma": jnp.ones((E,), jnp.float32) + 0.01 * jax.random.normal(ks[0], (E,)),
        "beta": 0.01 * jax.random.normal(ks[1], (E,)),
        "w_in": 0.05 * jax.random.normal(ks[2], (3 * E, E), jnp.float32),
        "b_in": 0.05 * jax.random.normal(ks[3], (3 * E,), jnp.float32),
        "w_out": 0.05 * jax.random.normal(ks[4], (E, E), jnp.float32),
        "b_out": 0.05 * jax.random.normal(ks[5], (E,), jnp.float32),
    }
    x = jax.random.normal(ks[6], (B, S, E), jnp.float32)

    out = multihead_attention_pallas(x, params, num_heads=H)
    out = jax.block_until_ready(out)

    ref = multihead_attention_ref(x, params, num_heads=H)
    assert out.shape == (B, S, E)
    # bf16 MXU operands (f32 accumulation) loosen accuracy vs. the f32 reference,
    # so the tolerance is relaxed relative to the pure-f32 version.
    assert jnp.allclose(out, ref, atol=2e-2, rtol=2e-2), (
        f"max abs err {jnp.max(jnp.abs(out - ref))}")

    print("KERNEL_OK")
</pallas_src>

<mosaic_0001>
module attributes {stable_mosaic.version = 11 : i64} {
  func.func @_mha_kernel(%arg0: i32, %arg1: memref<1x8x128xf32, #tpu.memory_space<vmem>>, %arg2: memref<1x128xf32, #tpu.memory_space<vmem>>, %arg3: memref<1x128xf32, #tpu.memory_space<vmem>>, %arg4: memref<128x384xbf16, #tpu.memory_space<vmem>>, %arg5: memref<1x384xf32, #tpu.memory_space<vmem>>, %arg6: memref<128x128xbf16, #tpu.memory_space<vmem>>, %arg7: memref<1x128xf32, #tpu.memory_space<vmem>>, %arg8: memref<1x8x128xf32, #tpu.memory_space<vmem>>, %arg9: memref<8x128xf32, #tpu.memory_space<vmem>>) attributes {dimension_semantics = [#tpu.dimension_semantics<parallel>], iteration_bounds = array<i64: 2>, scalar_prefetch = 0 : i64, scratch_operands = 1 : i64, tpu.core_type = #tpu.core_type<tc>, window_params = [{transform_indices = @transform_0, window_bounds = array<i64: 1, 8, 128>}, {pipeline_mode = #tpu.pipeline_mode<synchronous>, transform_indices = @transform_1, window_bounds = array<i64: 1, 128>}, {pipeline_mode = #tpu.pipeline_mode<synchronous>, transform_indices = @transform_2, window_bounds = array<i64: 1, 128>}, {pipeline_mode = #tpu.pipeline_mode<synchronous>, transform_indices = @transform_3, window_bounds = array<i64: 128, 384>}, {pipeline_mode = #tpu.pipeline_mode<synchronous>, transform_indices = @transform_4, window_bounds = array<i64: 1, 384>}, {pipeline_mode = #tpu.pipeline_mode<synchronous>, transform_indices = @transform_5, window_bounds = array<i64: 128, 128>}, {pipeline_mode = #tpu.pipeline_mode<synchronous>, transform_indices = @transform_6, window_bounds = array<i64: 1, 128>}, {transform_indices = @transform_7, window_bounds = array<i64: 1, 8, 128>}]} {
    %c0 = arith.constant 0 : index
    %c0_0 = arith.constant 0 : index
    %c0_1 = arith.constant 0 : index
    %0 = vector.load %arg1[%c0, %c0_0, %c0_1] : memref<1x8x128xf32, #tpu.memory_space<vmem>>, vector<1x8x128xf32>
    %1 = vector.shape_cast %0 : vector<1x8x128xf32> to vector<8x128xf32>
    %cst = arith.constant dense<0.000000e+00> : vector<8xf32>
    %2 = vector.multi_reduction <add>, %1, %cst [1] : vector<8x128xf32> to vector<8xf32>
    %3 = vector.shape_cast %2 : vector<8xf32> to vector<8x1xf32>
    %cst_2 = arith.constant 1.280000e+02 : f32
    %4 = vector.broadcast %cst_2 : f32 to vector<8x1xf32>
    %5 = arith.divf %3, %4 : vector<8x1xf32>
    %6 = vector.broadcast %5 : vector<8x1xf32> to vector<8x128xf32>
    %7 = arith.subf %1, %6 : vector<8x128xf32>
    %8 = arith.mulf %7, %7 : vector<8x128xf32>
    %cst_3 = arith.constant dense<0.000000e+00> : vector<8xf32>
    %9 = vector.multi_reduction <add>, %8, %cst_3 [1] : vector<8x128xf32> to vector<8xf32>
    %10 = vector.shape_cast %9 : vector<8xf32> to vector<8x1xf32>
    %cst_4 = arith.constant 1.280000e+02 : f32
    %11 = vector.broadcast %cst_4 : f32 to vector<8x1xf32>
    %12 = arith.divf %10, %11 : vector<8x1xf32>
    %13 = vector.broadcast %5 : vector<8x1xf32> to vector<8x128xf32>
    %14 = arith.subf %1, %13 : vector<8x128xf32>
    %cst_5 = arith.constant 9.99999974E-6 : f32
    %15 = vector.broadcast %cst_5 : f32 to vector<8x1xf32>
    %16 = arith.addf %12, %15 : vector<8x1xf32>
    %17 = math.rsqrt %16 : vector<8x1xf32>
    %18 = vector.broadcast %17 : vector<8x1xf32> to vector<8x128xf32>
    %19 = arith.mulf %14, %18 : vector<8x128xf32>
    %c0_6 = arith.constant 0 : index
    %c0_7 = arith.constant 0 : index
    %20 = vector.load %arg2[%c0_6, %c0_7] : memref<1x128xf32, #tpu.memory_space<vmem>>, vector<1x128xf32>
    %21 = vector.broadcast %20 : vector<1x128xf32> to vector<8x128xf32>
    %22 = arith.mulf %19, %21 : vector<8x128xf32>
    %c0_8 = arith.constant 0 : index
    %c0_9 = arith.constant 0 : index
    %23 = vector.load %arg3[%c0_8, %c0_9] : memref<1x128xf32, #tpu.memory_space<vmem>>, vector<1x128xf32>
    %24 = vector.broadcast %23 : vector<1x128xf32> to vector<8x128xf32>
    %25 = arith.addf %22, %24 : vector<8x128xf32>
    %26 = arith.truncf %25 : vector<8x128xf32> to vector<8x128xbf16>
    %c0_10 = arith.constant 0 : index
    %c0_11 = arith.constant 0 : index
    %27 = vector.load %arg4[%c0_10, %c0_11] : memref<128x384xbf16, #tpu.memory_space<vmem>>, vector<128x384xbf16>
    %cst_12 = arith.constant dense<0.000000e+00> : vector<8x384xf32>
    %28 = tpu.matmul %26, %27, %cst_12 {dimension_numbers = #tpu.dot_dimension_numbers<[1], [0], [0], [1], [0, 0, 1, 1], [], []>} : vector<8x128xbf16>, vector<128x384xbf16>, vector<8x384xf32> -> vector<8x384xf32>
    %c0_13 = arith.constant 0 : index
    %c0_14 = arith.constant 0 : index
    %29 = vector.load %arg5[%c0_13, %c0_14] : memref<1x384xf32, #tpu.memory_space<vmem>>, vector<1x384xf32>
    %30 = vector.broadcast %29 : vector<1x384xf32> to vector<8x384xf32>
    %31 = arith.addf %28, %30 : vector<8x384xf32>
    %32 = vector.extract_strided_slice %31 {offsets = [0, 0], sizes = [8, 32], strides = [1, 1]} : vector<8x384xf32> to vector<8x32xf32>
    %33 = vector.extract_strided_slice %31 {offsets = [0, 128], sizes = [8, 32], strides = [1, 1]} : vector<8x384xf32> to vector<8x32xf32>
    %34 = vector.extract_strided_slice %31 {offsets = [0, 256], sizes = [8, 32], strides = [1, 1]} : vector<8x384xf32> to vector<8x32xf32>
    %35 = arith.truncf %32 : vector<8x32xf32> to vector<8x32xbf16>
    %36 = arith.truncf %33 : vector<8x32xf32> to vector<8x32xbf16>
    %cst_15 = arith.constant dense<0.000000e+00> : vector<8x8xf32>
    %37 = tpu.matmul %35, %36, %cst_15 {dimension_numbers = #tpu.dot_dimension_numbers<[1], [1], [0], [0], [0, 0, 1, 0], [], []>} : vector<8x32xbf16>, vector<8x32xbf16>, vector<8x8xf32> -> vector<8x8xf32>
    %cst_16 = arith.constant 0.176776692 : f32
    %38 = vector.broadcast %cst_16 : f32 to vector<8x8xf32>
    %39 = arith.mulf %37, %38 : vector<8x8xf32>
    %cst_17 = arith.constant dense<0xFF800000> : vector<8xf32>
    %40 = vector.multi_reduction <maximumf>, %39, %cst_17 [1] : vector<8x8xf32> to vector<8xf32>
    %41 = vector.shape_cast %40 : vector<8xf32> to vector<8x1xf32>
    %42 = vector.broadcast %41 : vector<8x1xf32> to vector<8x8xf32>
    %43 = arith.subf %39, %42 : vector<8x8xf32>
    %44 = math.exp %43 : vector<8x8xf32>
    %cst_18 = arith.constant dense<0.000000e+00> : vector<8xf32>
    %45 = vector.multi_reduction <add>, %44, %cst_18 [1] : vector<8x8xf32> to vector<8xf32>
    %46 = vector.shape_cast %45 : vector<8xf32> to vector<8x1xf32>
    %47 = tpu.reciprocal %46 {approx = true} : vector<8x1xf32> -> vector<8x1xf32>
    %48 = vector.broadcast %47 : vector<8x1xf32> to vector<8x8xf32>
    %49 = arith.mulf %44, %48 : vector<8x8xf32>
    %50 = arith.truncf %49 : vector<8x8xf32> to vector<8x8xbf16>
    %51 = arith.truncf %34 : vector<8x32xf32> to vector<8x32xbf16>
    %cst_19 = arith.constant dense<0.000000e+00> : vector<8x32xf32>
    %52 = tpu.matmul %50, %51, %cst_19 {dimension_numbers = #tpu.dot_dimension_numbers<[1], [0], [0], [1], [0, 0, 1, 1], [], []>} : vector<8x8xbf16>, vector<8x32xbf16>, vector<8x32xf32> -> vector<8x32xf32>
    %c0_20 = arith.constant 0 : index
    %c0_21 = arith.constant 0 : index
    %53 = vector.load %arg9[%c0_20, %c0_21] : memref<8x128xf32, #tpu.memory_space<vmem>>, vector<8x32xf32>
    tpu.vector_store %arg9[%c0_20, %c0_21], %52 {strides = array<i32>} : memref<8x128xf32, #tpu.memory_space<vmem>>, vector<8x32xf32>,
    %54 = vector.extract_strided_slice %31 {offsets = [0, 32], sizes = [8, 32], strides = [1, 1]} : vector<8x384xf32> to vector<8x32xf32>
    %55 = vector.extract_strided_slice %31 {offsets = [0, 160], sizes = [8, 32], strides = [1, 1]} : vector<8x384xf32> to vector<8x32xf32>
    %56 = vector.extract_strided_slice %31 {offsets = [0, 288], sizes = [8, 32], strides = [1, 1]} : vector<8x384xf32> to vector<8x32xf32>
    %57 = arith.truncf %54 : vector<8x32xf32> to vector<8x32xbf16>
    %58 = arith.truncf %55 : vector<8x32xf32> to vector<8x32xbf16>
    %cst_22 = arith.constant dense<0.000000e+00> : vector<8x8xf32>
    %59 = tpu.matmul %57, %58, %cst_22 {dimension_numbers = #tpu.dot_dimension_numbers<[1], [1], [0], [0], [0, 0, 1, 0], [], []>} : vector<8x32xbf16>, vector<8x32xbf16>, vector<8x8xf32> -> vector<8x8xf32>
    %cst_23 = arith.constant 0.176776692 : f32
    %60 = vector.broadcast %cst_23 : f32 to vector<8x8xf32>
    %61 = arith.mulf %59, %60 : vector<8x8xf32>
    %cst_24 = arith.constant dense<0xFF800000> : vector<8xf32>
    %62 = vector.multi_reduction <maximumf>, %61, %cst_24 [1] : vector<8x8xf32> to vector<8xf32>
    %63 = vector.shape_cast %62 : vector<8xf32> to vector<8x1xf32>
    %64 = vector.broadcast %63 : vector<8x1xf32> to vector<8x8xf32>
    %65 = arith.subf %61, %64 : vector<8x8xf32>
    %66 = math.exp %65 : vector<8x8xf32>
    %cst_25 = arith.constant dense<0.000000e+00> : vector<8xf32>
    %67 = vector.multi_reduction <add>, %66, %cst_25 [1] : vector<8x8xf32> to vector<8xf32>
    %68 = vector.shape_cast %67 : vector<8xf32> to vector<8x1xf32>
    %69 = tpu.reciprocal %68 {approx = true} : vector<8x1xf32> -> vector<8x1xf32>
    %70 = vector.broadcast %69 : vector<8x1xf32> to vector<8x8xf32>
    %71 = arith.mulf %66, %70 : vector<8x8xf32>
    %72 = arith.truncf %71 : vector<8x8xf32> to vector<8x8xbf16>
    %73 = arith.truncf %56 : vector<8x32xf32> to vector<8x32xbf16>
    %cst_26 = arith.constant dense<0.000000e+00> : vector<8x32xf32>
    %74 = tpu.matmul %72, %73, %cst_26 {dimension_numbers = #tpu.dot_dimension_numbers<[1], [0], [0], [1], [0, 0, 1, 1], [], []>} : vector<8x8xbf16>, vector<8x32xbf16>, vector<8x32xf32> -> vector<8x32xf32>
    %c0_27 = arith.constant 0 : index
    %c32 = arith.constant 32 : index
    %75 = vector.load %arg9[%c0_27, %c32] : memref<8x128xf32, #tpu.memory_space<vmem>>, vector<8x32xf32>
    tpu.vector_store %arg9[%c0_27, %c32], %74 {strides = array<i32>} : memref<8x128xf32, #tpu.memory_space<vmem>>, vector<8x32xf32>,
    %76 = vector.extract_strided_slice %31 {offsets = [0, 64], sizes = [8, 32], strides = [1, 1]} : vector<8x384xf32> to vector<8x32xf32>
    %77 = vector.extract_strided_slice %31 {offsets = [0, 192], sizes = [8, 32], strides = [1, 1]} : vector<8x384xf32> to vector<8x32xf32>
    %78 = vector.extract_strided_slice %31 {offsets = [0, 320], sizes = [8, 32], strides = [1, 1]} : vector<8x384xf32> to vector<8x32xf32>
    %79 = arith.truncf %76 : vector<8x32xf32> to vector<8x32xbf16>
    %80 = arith.truncf %77 : vector<8x32xf32> to vector<8x32xbf16>
    %cst_28 = arith.constant dense<0.000000e+00> : vector<8x8xf32>
    %81 = tpu.matmul %79, %80, %cst_28 {dimension_numbers = #tpu.dot_dimension_numbers<[1], [1], [0], [0], [0, 0, 1, 0], [], []>} : vector<8x32xbf16>, vector<8x32xbf16>, vector<8x8xf32> -> vector<8x8xf32>
    %cst_29 = arith.constant 0.176776692 : f32
    %82 = vector.broadcast %cst_29 : f32 to vector<8x8xf32>
    %83 = arith.mulf %81, %82 : vector<8x8xf32>
    %cst_30 = arith.constant dense<0xFF800000> : vector<8xf32>
    %84 = vector.multi_reduction <maximumf>, %83, %cst_30 [1] : vector<8x8xf32> to vector<8xf32>
    %85 = vector.shape_cast %84 : vector<8xf32> to vector<8x1xf32>
    %86 = vector.broadcast %85 : vector<8x1xf32> to vector<8x8xf32>
    %87 = arith.subf %83, %86 : vector<8x8xf32>
    %88 = math.exp %87 : vector<8x8xf32>
    %cst_31 = arith.constant dense<0.000000e+00> : vector<8xf32>
    %89 = vector.multi_reduction <add>, %88, %cst_31 [1] : vector<8x8xf32> to vector<8xf32>
    %90 = vector.shape_cast %89 : vector<8xf32> to vector<8x1xf32>
    %91 = tpu.reciprocal %90 {approx = true} : vector<8x1xf32> -> vector<8x1xf32>
    %92 = vector.broadcast %91 : vector<8x1xf32> to vector<8x8xf32>
    %93 = arith.mulf %88, %92 : vector<8x8xf32>
    %94 = arith.truncf %93 : vector<8x8xf32> to vector<8x8xbf16>
    %95 = arith.truncf %78 : vector<8x32xf32> to vector<8x32xbf16>
    %cst_32 = arith.constant dense<0.000000e+00> : vector<8x32xf32>
    %96 = tpu.matmul %94, %95, %cst_32 {dimension_numbers = #tpu.dot_dimension_numbers<[1], [0], [0], [1], [0, 0, 1, 1], [], []>} : vector<8x8xbf16>, vector<8x32xbf16>, vector<8x32xf32> -> vector<8x32xf32>
    %c0_33 = arith.constant 0 : index
    %c64 = arith.constant 64 : index
    %97 = vector.load %arg9[%c0_33, %c64] : memref<8x128xf32, #tpu.memory_space<vmem>>, vector<8x32xf32>
    tpu.vector_store %arg9[%c0_33, %c64], %96 {strides = array<i32>} : memref<8x128xf32, #tpu.memory_space<vmem>>, vector<8x32xf32>,
    %98 = vector.extract_strided_slice %31 {offsets = [0, 96], sizes = [8, 32], strides = [1, 1]} : vector<8x384xf32> to vector<8x32xf32>
    %99 = vector.extract_strided_slice %31 {offsets = [0, 224], sizes = [8, 32], strides = [1, 1]} : vector<8x384xf32> to vector<8x32xf32>
    %100 = vector.extract_strided_slice %31 {offsets = [0, 352], sizes = [8, 32], strides = [1, 1]} : vector<8x384xf32> to vector<8x32xf32>
    %101 = arith.truncf %98 : vector<8x32xf32> to vector<8x32xbf16>
    %102 = arith.truncf %99 : vector<8x32xf32> to vector<8x32xbf16>
    %cst_34 = arith.constant dense<0.000000e+00> : vector<8x8xf32>
    %103 = tpu.matmul %101, %102, %cst_34 {dimension_numbers = #tpu.dot_dimension_numbers<[1], [1], [0], [0], [0, 0, 1, 0], [], []>} : vector<8x32xbf16>, vector<8x32xbf16>, vector<8x8xf32> -> vector<8x8xf32>
    %cst_35 = arith.constant 0.176776692 : f32
    %104 = vector.broadcast %cst_35 : f32 to vector<8x8xf32>
    %105 = arith.mulf %103, %104 : vector<8x8xf32>
    %cst_36 = arith.constant dense<0xFF800000> : vector<8xf32>
    %106 = vector.multi_reduction <maximumf>, %105, %cst_36 [1] : vector<8x8xf32> to vector<8xf32>
    %107 = vector.shape_cast %106 : vector<8xf32> to vector<8x1xf32>
    %108 = vector.broadcast %107 : vector<8x1xf32> to vector<8x8xf32>
    %109 = arith.subf %105, %108 : vector<8x8xf32>
    %110 = math.exp %109 : vector<8x8xf32>
    %cst_37 = arith.constant dense<0.000000e+00> : vector<8xf32>
    %111 = vector.multi_reduction <add>, %110, %cst_37 [1] : vector<8x8xf32> to vector<8xf32>
    %112 = vector.shape_cast %111 : vector<8xf32> to vector<8x1xf32>
    %113 = tpu.reciprocal %112 {approx = true} : vector<8x1xf32> -> vector<8x1xf32>
    %114 = vector.broadcast %113 : vector<8x1xf32> to vector<8x8xf32>
    %115 = arith.mulf %110, %114 : vector<8x8xf32>
    %116 = arith.truncf %115 : vector<8x8xf32> to vector<8x8xbf16>
    %117 = arith.truncf %100 : vector<8x32xf32> to vector<8x32xbf16>
    %cst_38 = arith.constant dense<0.000000e+00> : vector<8x32xf32>
    %118 = tpu.matmul %116, %117, %cst_38 {dimension_numbers = #tpu.dot_dimension_numbers<[1], [0], [0], [1], [0, 0, 1, 1], [], []>} : vector<8x8xbf16>, vector<8x32xbf16>, vector<8x32xf32> -> vector<8x32xf32>
    %c0_39 = arith.constant 0 : index
    %c96 = arith.constant 96 : index
    %119 = vector.load %arg9[%c0_39, %c96] : memref<8x128xf32, #tpu.memory_space<vmem>>, vector<8x32xf32>
    tpu.vector_store %arg9[%c0_39, %c96], %118 {strides = array<i32>} : memref<8x128xf32, #tpu.memory_space<vmem>>, vector<8x32xf32>,
    %c0_40 = arith.constant 0 : index
    %c0_41 = arith.constant 0 : index
    %120 = vector.load %arg9[%c0_40, %c0_41] : memref<8x128xf32, #tpu.memory_space<vmem>>, vector<8x128xf32>
    %121 = arith.truncf %120 : vector<8x128xf32> to vector<8x128xbf16>
    %c0_42 = arith.constant 0 : index
    %c0_43 = arith.constant 0 : index
    %122 = vector.load %arg6[%c0_42, %c0_43] : memref<128x128xbf16, #tpu.memory_space<vmem>>, vector<128x128xbf16>
    %cst_44 = arith.constant dense<0.000000e+00> : vector<8x128xf32>
    %123 = tpu.matmul %121, %122, %cst_44 {dimension_numbers = #tpu.dot_dimension_numbers<[1], [0], [0], [1], [0, 0, 1, 1], [], []>} : vector<8x128xbf16>, vector<128x128xbf16>, vector<8x128xf32> -> vector<8x128xf32>
    %c0_45 = arith.constant 0 : index
    %c0_46 = arith.constant 0 : index
    %124 = vector.load %arg7[%c0_45, %c0_46] : memref<1x128xf32, #tpu.memory_space<vmem>>, vector<1x128xf32>
    %125 = vector.broadcast %124 : vector<1x128xf32> to vector<8x128xf32>
    %126 = arith.addf %123, %125 : vector<8x128xf32>
    %c0_47 = arith.constant 0 : index
    %c0_48 = arith.constant 0 : index
    %c0_49 = arith.constant 0 : index
    %127 = vector.load %arg8[%c0_47, %c0_48, %c0_49] : memref<1x8x128xf32, #tpu.memory_space<vmem>>, vector<1x8x128xf32>
    %128 = vector.shape_cast %127 : vector<1x8x128xf32> to vector<8x128xf32>
    %129 = vector.shape_cast %126 : vector<8x128xf32> to vector<1x8x128xf32>
    tpu.vector_store %arg8[%c0_47, %c0_48, %c0_49], %129 {strides = array<i32>} : memref<1x8x128xf32, #tpu.memory_space<vmem>>, vector<1x8x128xf32>,
    return
  }
  func.func @transform_0(%arg0: i32) -> (i32, i32, i32) {
    %c0_i32 = arith.constant 0 : i32
    %c0_i32_0 = arith.constant 0 : i32
    %c0_i32_1 = arith.constant 0 : i32
    return %arg0, %c0_i32, %c0_i32_0 : i32, i32, i32
  }
  func.func @transform_1(%arg0: i32) -> (i32, i32) {
    %c0_i32 = arith.constant 0 : i32
    %c0_i32_0 = arith.constant 0 : i32
    %c0_i32_1 = arith.constant 0 : i32
    return %c0_i32, %c0_i32_0 : i32, i32
  }
  func.func @transform_2(%arg0: i32) -> (i32, i32) {
    %c0_i32 = arith.constant 0 : i32
    %c0_i32_0 = arith.constant 0 : i32
    %c0_i32_1 = arith.constant 0 : i32
    return %c0_i32, %c0_i32_0 : i32, i32
  }
  func.func @transform_3(%arg0: i32) -> (i32, i32) {
    %c0_i32 = arith.constant 0 : i32
    %c0_i32_0 = arith.constant 0 : i32
    %c0_i32_1 = arith.constant 0 : i32
    return %c0_i32, %c0_i32_0 : i32, i32
  }
  func.func @transform_4(%arg0: i32) -> (i32, i32) {
    %c0_i32 = arith.constant 0 : i32
    %c0_i32_0 = arith.constant 0 : i32
    %c0_i32_1 = arith.constant 0 : i32
    return %c0_i32, %c0_i32_0 : i32, i32
  }
  func.func @transform_5(%arg0: i32) -> (i32, i32) {
    %c0_i32 = arith.constant 0 : i32
    %c0_i32_0 = arith.constant 0 : i32
    %c0_i32_1 = arith.constant 0 : i32
    return %c0_i32, %c0_i32_0 : i32, i32
  }
  func.func @transform_6(%arg0: i32) -> (i32, i32) {
    %c0_i32 = arith.constant 0 : i32
    %c0_i32_0 = arith.constant 0 : i32
    %c0_i32_1 = arith.constant 0 : i32
    return %c0_i32, %c0_i32_0 : i32, i32
  }
  func.func @transform_7(%arg0: i32) -> (i32, i32, i32) {
    %c0_i32 = arith.constant 0 : i32
    %c0_i32_0 = arith.constant 0 : i32
    %c0_i32_1 = arith.constant 0 : i32
    return %arg0, %c0_i32, %c0_i32_0 : i32, i32, i32
  }
}

</mosaic_0001>

<bundles_post_ra>
// kernel: tpu_custom_call.1
= control target key start
LH: loop header
LB: loop body
LE: loop exit
PB: predicated region body
PF: predicated region fallthrough
CT: control target
= control target key end

     0   :  { %12 = vsyncpa [#allocation4], 0  ;;  %s2155_s0 = inlined_call_operand.hbm [shape: f32[2,8,128], index: 0, kind: input, shape index: {}]   ;;  %s2156_s1 = inlined_call_operand.vmem [shape: f32[1,128], index: 1, kind: input, shape index: {}]   ;;  %s2157_s2 = inlined_call_operand.vmem [shape: f32[1,128], index: 2, kind: input, shape index: {}]   ;;  %s2158_s3 = inlined_call_operand.hbm [shape: bf16[128,384], index: 3, kind: input, shape index: {}]   ;;  %s2159_s4 = inlined_call_operand.vmem [shape: f32[1,384], index: 4, kind: input, shape index: {}]   ;;  %s2160_s5 = inlined_call_operand.hbm [shape: bf16[128,128], index: 5, kind: input, shape index: {}]   ;;  %s2161_s6 = inlined_call_operand.vmem [shape: f32[1,128], index: 6, kind: input, shape index: {}]   ;;  %s2162_s7 = inlined_call_operand.hbm [shape: f32[2,8,128], index: 7, kind: output, shape index: {}]  }
   0x1   :  { %14 = vsyncpa [#allocation4 + $0x1], 0 }
   0x2   :  { %15 = vsyncpa [#allocation7], 0 }
   0x3   :  { %16 = vsyncpa [#allocation5], 0 }
   0x4   :  { %18 = vsyncpa [#allocation5 + $0x1], 0  ;;  %s1823_s24 = smov 0   ;;  %s1825_s25 = smov 0  }
   0x5   :  { %s1827_s26 = smov 0   ;;  %s1829_s27 = smov 0  }
   0x6 LB: > { %s1844_s28 = sadd.s32 4294967295, %s1767_s27   ;;  %s1295_s29 = sadd.s32 4294967294, %s1767_s27   ;;  %s1767_s27 = sphi %s1829_s27, %s2182_s27   ;;  %s1763_s26 = sphi %s1827_s26, %s2181_s26   ;;  %s1759_s25 = sphi %s1825_s25, %s2180_s25   ;;  %s1755_s24 = sphi %s1823_s24, %s2179_s24  }
   0x7   : > { %p44_p0 = scmp.ne.s32.totalorder %s1759_s25, %s1755_s24  ;;  %p2163_p1 = scmp.eq.s32.totalorder %s1844_s28, 0 }
   0x8   : > { %p200_p3 = scmp.eq.s32.totalorder %s1295_s29, 1  ;;  %p1296_p5 = scmp.ge.s32.totalorder %s1767_s27, 1 }
   0x9   : > { %p1853_p4 = por %p2163_p1, %p44_p0  ;;  %p207_p7 = scmp.lt.s32.totalorder %s1767_s27, 3 }
   0xa   : > { %p1858_p6 = por %p200_p3, %p44_p0  ;;  %s1769_s10 = smov [#allocation6]  }
   0xb   : > { %s2166_s30 = scalar_select %p1853_p4, 1, 0 }
   0xc   : > { %s2167_s8 = scalar_select %p1858_p6, 1, 0 }
   0xd   : > { %p1863_p8 = pnand %p1296_p5, %p207_p7  ;;  %s225_s11 = sshll.u32 %s1769_s10, 4  ;;  %s1867_s11 = int_to_ptr.vmem [resolvable:$true] %s225_s11 }
   0xe   : > { %s1770_s13 = smov [#allocation8]   ;;  %s1611_s17 = scalar_lea.hbm %s2158_s3, 3072 }
   0xf   : > { %p1488_p9 = pneg %p1863_p8  ;;  %s241_s14 = sshll.u32 %s1770_s13, 4  ;;  %s1878_s14 = int_to_ptr.vmem [resolvable:$true] %s241_s14 }
  0x10   : > { %p1612_p12 = scmp.ne.s32.totalorder %s2158_s3, %s1611_s17  ;;  %p1618_p5 = scmp.lt.u32.totalorder %s1611_s17, %s2158_s3 }
  0x11   : > { %p1874_p11 = pnand %p1488_p9, %p2163_p1 }
  0x13   : > { %p1613_p13 = pneg %p1874_p11 }
  0x15   : > { %p1614_p0 = pnand %p1613_p13, %p1612_p12 }
  0x17   : > { %p1615_p3 = pneg %p1614_p0 }
  0x19   : > { %p1620_p7 = pnand %p1618_p5, %p1615_p3 }
  0x1b   : > { %1623 = shalt.err (!%p1620_p7)
}
  0x1c   : > { %s1624_s22 = scalar_lea.vmem %s1867_s11, 3072  ;;  %p1632_p2 = scmp.lt.s32.totalorder %s1867_s11, %s1867_s11 }
  0x1d   : > { %p1625_p9 = scmp.ne.s32.totalorder %s1867_s11, %s1624_s22  ;;  %p1633_p12 = scmp.lt.s32.totalorder %s1624_s22, %s1624_s22 }
  0x1f   : > { %p1627_p10 = pnand %p1625_p9, %p1613_p13  ;;  %p1634_p0 = por %p1633_p12, %p1632_p2 }
  0x21   : > { %p1628_p1 = pneg %p1627_p10 }
  0x23   : > { %p1635_p6 = pnand %p1634_p0, %p1628_p1 }
  0x25   : > { %1638 = shalt.err (!%p1635_p6)
}
  0x26   : > { %s1771_s23 = smov 192   ;;  %s1772_s29 = smov 12  }
  0x27   : > { %1491 = dma.hbm_to_vmem [thread:$0]  (!%p1874_p11), %s2158_s3, 3072, %s1867_s11, [#allocation7], %s1771_s23, %s1771_s23, %s1772_s29  }
  0x28   : > { %s1639_s17 = scalar_lea.hbm %s2160_s5, 1024 }
  0x29   : > { %p1640_p2 = scmp.ne.s32.totalorder %s2160_s5, %s1639_s17  ;;  %p1646_p10 = scmp.lt.u32.totalorder %s1639_s17, %s2160_s5 }
  0x2b   : > { %p1642_p1 = pnand %p1640_p2, %p1613_p13 }
  0x2d   : > { %p1643_p6 = pneg %p1642_p1 }
  0x2f   : > { %p1648_p3 = pnand %p1646_p10, %p1643_p6 }
  0x31   : > { %1651 = shalt.err (!%p1648_p3)
}
  0x32   : > { %s1652_s11 = scalar_lea.vmem %s1878_s14, 1024  ;;  %p1660_p12 = scmp.lt.s32.totalorder %s1878_s14, %s1878_s14 }
  0x33   : > { %p1653_p5 = scmp.ne.s32.totalorder %s1878_s14, %s1652_s11  ;;  %p1661_p0 = scmp.lt.s32.totalorder %s1652_s11, %s1652_s11 }
  0x35   : > { %p1655_p7 = pnand %p1653_p5, %p1613_p13  ;;  %p1662_p2 = por %p1661_p0, %p1660_p12 }
  0x37   : > { %p1656_p9 = pneg %p1655_p7 }
  0x39   : > { %p1663_p1 = pnand %p1662_p2, %p1656_p9 }
  0x3b   : > { %1666 = shalt.err (!%p1663_p1)
}
  0x3c   : > { %s1773_s22 = smov 64   ;;  %s1774_s23 = smov 4  }
  0x3d   : > { %1494 = dma.hbm_to_vmem [thread:$0]  (!%p1874_p11), %s2160_s5, 1024, %s1878_s14, [#allocation7], %s1773_s22, %s1773_s22, %s1774_s23  }
  0x3e   : > { %s1933_s13 = sadd.s32 1, %s1767_s27   ;;  %s31_s16 = sadd.s32 1, %s1763_s26 }
  0x3f   : > { %s28_s15 = ssub.s32 %s1767_s27, %s1933_s13  ;;  %p38_p6 = scmp.ne.s32.totalorder %s1763_s26, %s1759_s25 }
  0x40   : > { %p29_p13 = scmp.eq.s32.totalorder %s28_s15, 0  ;;  %p39_p10 = scmp.eq.s32.totalorder %s1767_s27, 0 }
  0x41   : > { %p2170_p5 = scmp.eq.s32.totalorder %s1844_s28, 1  ;;  %p1505_p9 = scmp.lt.s32.totalorder %s1767_s27, 2 }
  0x42   : > { %s1942_s17 = scalar_select %p29_p13, %s1763_s26, %s31_s16  }
  0x43   : > { %p40_p3 = por %p39_p10, %p38_p6  ;;  %p1946_p7 = por %p2170_p5, %p38_p6 }
  0x44   : > { %s258_s12 = sand.u32 1, %s1763_s26   ;;  %s1301_s14 = sshll.u32 %s1767_s27, 7 }
  0x45   : > { %s2171_s18 = scalar_select %p1946_p7, 1, 0 }
  0x46   : > { %s1300_s19 = sshll.u32 %s258_s12, 3  ;;  %s1956_s11 = scalar_lea.hbm %s2155_s0, %s1301_s14 }
  0x47   : > { %s262_s22 = scalar_lea.vmem [#allocation3], %s1300_s19  ;;  %p1960_p11 = pnand %p1505_p9, %p40_p3 }
  0x48   : > { %s269_s23 = sshll.u32 %s262_s22, 4  ;;  %s259_s10 = scalar_lea.sflag [#allocation4], %s258_s12  ;;  %s1958_s23 = int_to_ptr.vmem [resolvable:$true] %s269_s23 }
  0x49   : > { %s1667_s15 = scalar_lea.hbm %s1956_s11, 128  ;;  %p1669_p0 = pneg %p1960_p11 }
  0x4a   : > { %p1668_p12 = scmp.ne.s32.totalorder %s1956_s11, %s1667_s15  ;;  %s1672_s14 = scalar_lea.hbm %s2155_s0, 256 }
  0x4b   : > { %p1673_p13 = scmp.lt.u32.totalorder %s1956_s11, %s2155_s0  ;;  %p1674_p6 = scmp.lt.u32.totalorder %s1672_s14, %s1667_s15 }
  0x4c   : > { %p1670_p2 = pnand %p1669_p0, %p1668_p12  ;;  %p1676_p3 = scmp.lt.u32.totalorder %s1667_s15, %s1956_s11 }
  0x4d   : > { %p1675_p10 = por %p1674_p6, %p1673_p13 }
  0x4e   : > { %p1671_p1 = pneg %p1670_p2 }
  0x4f   : > { %p1677_p5 = por %p1676_p3, %p1675_p10 }
  0x51   : > { %p1678_p9 = pnand %p1677_p5, %p1671_p1 }
  0x53   : > { %1681 = shalt.err (!%p1678_p9)
}
  0x54   : > { %s1682_s12 = scalar_lea.vmem %s1958_s23, 128  ;;  %s1775_s22 = smov [#allocation3]  }
  0x55   : > { %p1683_p12 = scmp.ne.s32.totalorder %s1958_s23, %s1682_s12  ;;  %s1687_s16 = sshll.u32 %s1775_s22, 4  ;;  %s1688_s16 = int_to_ptr.vmem [resolvable:$false] %s1687_s16 }
  0x56   : > { %s1689_s19 = scalar_lea.vmem %s1688_s16, 256  ;;  %p1690_p4 = scmp.lt.s32.totalorder %s1958_s23, %s1688_s16 }
  0x57   : > { %p1685_p2 = pnand %p1683_p12, %p1669_p0  ;;  %p1691_p13 = scmp.lt.s32.totalorder %s1689_s19, %s1682_s12 }
  0x59   : > { %p1686_p7 = pneg %p1685_p2  ;;  %p1692_p6 = por %p1691_p13, %p1690_p4 }
  0x5b   : > { %p1693_p10 = pnand %p1692_p6, %p1686_p7 }
  0x5d   : > { %1696 = shalt.err (!%p1693_p10)
}
  0x5e   : > { %1498 = dma.hbm_to_vmem [thread:$0]  (!%p1960_p11), %s1956_s11, 128, %s1958_s23, %s259_s10  }
  0x5f   : > { %278 = sbr.rel (%p1863_p8) target bundleno = 2294 (0x8f6), region = 48  ;;  %s1992_s15 = sand.u32 (!%p1863_p8), 1, %s1759_s25  }
  0x60   : > { %s1303_s14 = sshll.u32 (!%p1863_p8), %s1992_s15, 3  ;;  %s281_s20 = scalar_lea.sflag (!%p1863_p8), [#allocation4], %s1992_s15 }
  0x61   : > { %s284_s21 = scalar_lea.vmem (!%p1863_p8), [#allocation3], %s1303_s14  ;;  %p2173_p4 = scmp.ne.s32.totalorder (!%p1863_p8), %s2166_s30, 0 }
  0x66   : > { %1742 = dma.done.wait (%p2173_p4), %s281_s20, 128  }
  0x67   : > { %1744 = vsyncadd (%p2173_p4), %s281_s20, 4294967168  ;;  %p2174_p7 = scmp.eq.s32.totalorder %s1844_s28, 0 }
  0x69   : > { %1746 = dma.done.wait (%p2174_p7), [#allocation7], 4096   ;;  %p2175_p8 = pmov %p2174_p7 }
  0x6a   : > { %v324_v0 = vld [vmem:[%s284_s21] sm:$0xff]  ;;  %v1555_v2 = vld [vmem:[#allocation6] ss:$12 sps:$4 sm:$0xff]   ;;  %v1776_v3 = vmov 0.0   ;;  %v1777_v25 = vmov 0   ;;  %vm1778_vm0 = vmmov 0   ;;  %v388_v41 = vlaneseq }
  0x6b   : > { %1748 = vsyncadd (%p2175_p8), [#allocation7], 4294963200  ;;  %325 = vadd.xlane.f32.xlu0 %v324_v0  ;;  %v1553_v1 = vld [vmem:[#allocation6 + $0x4] ss:$12 sps:$4 sm:$0xff]   ;;  %1388 = vmatprep.subr.bf16.mxu1 %v1776_v3  ;;  %v1556_v4 = vld [vmem:[#allocation6 + $0x8] ss:$12 sps:$4 sm:$0xff]  }
  0x6c   : > { %v1557_v5 = vld [vmem:[#allocation6 + $0x1c] ss:$12 sps:$4 sm:$0xff]   ;;  %531 = vmatprep.subr.bf16.mxu0 %v1553_v1  ;;  %1389 = vmatpush3.bf16.msra.mxu1 %v1556_v4  ;;  %v1559_v6 = vld [vmem:[#allocation6 + $0x18] ss:$12 sps:$4 sm:$0xff]   ;;  %v1560_v7 = vld [vmem:[#allocation6 + $0x20] ss:$12 sps:$4 sm:$0xff]  }
  0x6d   : > { %532 = vmatpush1.bf16.msra.mxu0 %v1555_v2  ;;  %1390 = vmatprep.subr.bf16.mxu1 %v1776_v3  ;;  %v1561_v8 = vld [vmem:[#allocation6 + $0x34] ss:$12 sps:$4 sm:$0xff]   ;;  %v1563_v13 = vld [vmem:[#allocation6 + $0x30] ss:$12 sps:$4 sm:$0xff]   ;;  %v1564_v14 = vld [vmem:[#allocation6 + $0x38] ss:$12 sps:$4 sm:$0xff]  }
  0x6e   : > { %533 = vmatprep.subr.bf16.mxu0 %v1557_v5  ;;  %v1565_v15 = vld [vmem:[#allocation6 + $0x4c] ss:$12 sps:$4 sm:$0xff]   ;;  %v1567_v16 = vld [vmem:[#allocation6 + $0x48] ss:$12 sps:$4 sm:$0xff]   ;;  %v1568_v17 = vld [vmem:[#allocation6 + $0x50] ss:$12 sps:$4 sm:$0xff]   ;;  %563 = vmatprep.mubr.bf16.mxu0 %v1777_v25 }
  0x6f   : > { %v1569_v18 = vld [vmem:[#allocation6 + $0x64] ss:$12 sps:$4 sm:$0xff]   ;;  %v1571_v19 = vld [vmem:[#allocation6 + $0x60] ss:$12 sps:$4 sm:$0xff]   ;;  %v1572_v20 = vld [vmem:[#allocation6 + $0x68] ss:$12 sps:$4 sm:$0xff]   ;;  %1404 = vmatprep.mubr.msk.bf16.mxu1 %vm1778_vm0, %v1776_v3 }
  0x70   : > { %1391 = vmatpush3.bf16.msra.mxu1 %v1560_v7  ;;  %v1573_v21 = vld [vmem:[#allocation6 + $0x7c] ss:$12 sps:$4 sm:$0xff]   ;;  %v1575_v22 = vld [vmem:[#allocation6 + $0x78] ss:$12 sps:$4 sm:$0xff]   ;;  %v1576_v23 = vld [vmem:[#allocation6 + $0x80] ss:$12 sps:$4 sm:$0xff]  }
  0x71   : > { %534 = vmatpush1.bf16.msra.mxu0 %v1559_v6  ;;  %1392 = vmatprep.subr.bf16.mxu1 %v1776_v3  ;;  %v1577_v24 = vld [vmem:[#allocation6 + $0x94] ss:$12 sps:$4 sm:$0xff]   ;;  %v1579_v26 = vld [vmem:[#allocation6 + $0x90] ss:$12 sps:$4 sm:$0xff]   ;;  %v1580_v27 = vld [vmem:[#allocation6 + $0x98] ss:$12 sps:$4 sm:$0xff]  }
  0x72   : > { %535 = vmatprep.subr.bf16.mxu0 %v1561_v8  ;;  %v1581_v28 = vld [vmem:[#allocation6 + $0xac] ss:$12 sps:$4 sm:$0xff]   ;;  %v1583_v29 = vld [vmem:[#allocation6 + $0xa8] ss:$12 sps:$4 sm:$0xff]   ;;  %v1584_v30 = vld [vmem:[#allocation6 + $0xb0] ss:$12 sps:$4 sm:$0xff]  }
  0x73   : > { %v1307_v35 = vld [vmem:[%s2156_s1] ss:$0 sm:$0xff]  ;;  %v389_v42 = vshrl.u32 %v388_v41, 7  ;;  %vm614_vm1 = vcmask 261120   ;;  %s1779_s12 = smov 96   ;;  %s1780_s22 = smov 32  }
  0x74   : > { %1393 = vmatpush3.bf16.msra.mxu1 %v1564_v14  ;;  %v1308_v37 = vld [vmem:[%s2157_s2] ss:$0 sm:$0xff]  ;;  %vm679_vm2 = vcmask 1043456   ;;  %vm662_vm3 = vcmask 64512   ;;  %s1781_s16 = smov 64   ;;  %vm842_vm4 = vcmask 523520  }
  0x75   : > { %536 = vmatpush1.bf16.msra.mxu0 %v1563_v13  ;;  %1394 = vmatprep.subr.bf16.mxu1 %v1776_v3  ;;  %v394_v43 = vsub.s32 1, %v389_v42  ;;  %v386_v44 = vld [vmem:[%s2159_s4] sm:$0x7]  ;;  %v398_v45 = vsub.s32 2, %v389_v42  ;;  %v390_v47 = vsub.s32 0, %v389_v42  ;;  %vm959_vm5 = vcmask 785920  }
  0x76   : > { %537 = vmatprep.subr.bf16.mxu0 %v1565_v15  ;;  %vm1076_vm6 = vcmask 1048320   ;;  %s1351_s21 = sshll.u32 %s1844_s28, 7  ;;  %s322_s30 = scalar_lea.vmem [#allocation9], %s1303_s14 }
  0x77   : > { %v395_v46 = vrot.slane %v386_v44, %v394_v43  ;;  %v399_v52 = vrot.slane %v386_v44, %v398_v45  ;;  %v391_v58 = vrot.slane %v386_v44, %v390_v47  ;;  %s1206_s9 = sshll.u32 %s322_s30, 4  ;;  %s2111_s29 = scalar_lea.hbm %s2162_s7, %s1351_s21  ;;  %s2113_s9 = int_to_ptr.vmem [resolvable:$true] %s1206_s9 }
  0x78   : > { %1395 = vmatpush3.bf16.msra.mxu1 %v1568_v17  ;;  %s1193_s28 = scalar_lea.sflag [#allocation5], %s1992_s15  ;;  %s1697_s10 = scalar_lea.vmem %s2113_s9, 128 }
  0x79   : > { %538 = vmatpush1.bf16.msra.mxu0 %v1567_v16  ;;  %1396 = vmatprep.subr.bf16.mxu1 %v1776_v3  ;;  %p1698_p11 = scmp.ne.s32.totalorder %s2113_s9, %s1697_s10  ;;  %p2176_p0 = scmp.ne.s32.totalorder %s2171_s18, 0 }
  0x7a   : > { %539 = vmatprep.subr.bf16.mxu0 %v1569_v18  ;;  %s1782_s14 = smov [#allocation9]  }
  0x7b   : > { %p1699_p1 = pnand %p1698_p11, %p2176_p0 }
  0x7c   : > { %1397 = vmatpush3.bf16.msra.mxu1 %v1572_v20 }
  0x7d   : > { %540 = vmatpush1.bf16.msra.mxu0 %v1571_v19  ;;  %1398 = vmatprep.subr.bf16.mxu1 %v1776_v3  ;;  %p1700_p3 = pneg %p1699_p1 }
  0x7e   : > { %541 = vmatprep.subr.bf16.mxu0 %v1573_v21 }
  0x80   : > { %1399 = vmatpush3.bf16.msra.mxu1 %v1576_v23 }
  0x81   : > { %542 = vmatpush1.bf16.msra.mxu0 %v1575_v22  ;;  %1400 = vmatprep.subr.bf16.mxu1 %v1776_v3 }
  0x82   : > { %543 = vmatprep.subr.bf16.mxu0 %v1577_v24 }
  0x84   : > { %1401 = vmatpush3.bf16.msra.mxu1 %v1580_v27 }
  0x85   : > { %544 = vmatpush1.bf16.msra.mxu0 %v1579_v26  ;;  %1402 = vmatprep.subr.bf16.mxu1 %v1776_v3 }
  0x86   : > { %545 = vmatprep.subr.bf16.mxu0 %v1581_v28 }
  0x88   : > { %1403 = vmatpush3.bf16.msra.mxu1 %v1584_v30 }
  0x89   : > { %546 = vmatpush1.bf16.msra.mxu0 %v1583_v29  ;;  %1408 = vmatprep.subr.bf16.mxu1 %v1776_v3 }
  0x8a   : > { %1432 = vmatprep.subr.bf16.mxu0 %v1776_v3 }
  0xf8   : > { %v326_v9 = vpop.xlane.xlu0 %325 }
  0xf9   : > { %v328_v10 = vmul.f32 0.0078125, %v326_v9 }
  0xfb   : > { %v329_v11 = vsub.f32 %v324_v0, %v328_v10 }
  0xfd   : > { %v330_v12 = vmul.f32 %v329_v11, %v329_v11 }
  0xff   : > { %331 = vadd.xlane.f32.xlu0 %v330_v12 }
 0x18c   : > { %v332_v31 = vpop.xlane.xlu0 %331 }
 0x18d   : > { %v333_v32 = vmul.f32 0.0078125, %v332_v31 }
 0x18f   : > { %v334_v33 = vadd.f32 1e-05, %v333_v32 }
 0x191   : > { %1593 = vrsqrt.f32 %v334_v33 }
 0x19b   : > { %v1594_v34 = vpop.eup %1593 }
 0x19c   : > { %v336_v36 = vmul.f32 %v1594_v34, %v329_v11 }
 0x19e   : > { %v344_v38 = vmul.f32 %v1307_v35, %v336_v36 }
 0x1a0   : > { %v352_v39 = vadd.f32 %v1308_v37, %v344_v38 }
 0x1a2   : > { %v353_v40 = vpack.c.bf16 %v352_v39, %v352_v39 }
 0x1a4   : > { %564 = vmatmul.mubr.bf16.vlgmr.msra.gmra.mrb[0].mxu0 %v353_v40  ;;  %1405 = vmatmul.mubr.bf16.vlgmr.msra.gmra.mrb[0].mxu1 %v353_v40 }
 0x1a5   : > { %1410 = vmatprep.mubr.msk.bf16.mxu1 %vm1778_vm0, %v1776_v3  ;;  %1434 = vmatprep.mubr.msk.bf16.mxu0 %vm1778_vm0, %v1776_v3 }
 0x277   : > { %v565_v48 = vpop.f32.mrb[0].mxu0  ;;  %v606_v49 = vpop.f32.mrb[0].mxu1 }
 0x278   : > { %v567_v50 = vpop.f32.mrb[1].mxu0  ;;  %v1406_v51 = vpop.f32.mrb[1].mxu1  ;;  %v607_v60 = vadd.f32 %v606_v49, %v399_v52  ;;  %v566_v62 = vadd.f32 %v565_v48, %v391_v58 }
 0x279   : > { %v568_v53 = vadd.f32 %v567_v50, %v395_v46  ;;  %v569_v54 = vpop.f32.mrb[2].mxu0  ;;  %v609_v55 = vpop.f32.mrb[2].mxu1 }
 0x27a   : > { %v570_v56 = vpop.f32.mrb[3].mxu0  ;;  %v1407_v57 = vpop.f32.mrb[3].mxu1  ;;  %v2034_v63 = vpack.c.bf16 %v607_v60, %v607_v60  ;;  %v612_v0 = vpack.c.bf16 %v566_v62, %v566_v62 }
 0x27b   : > { %v613_v59 = vpack.c.bf16 %v568_v53, %v568_v53 }
 0x27c   : > { %v681_v1 = vsel %vm679_vm2, %v2034_v63, 0 }
 0x27d   : > { %728 = vrot.lane.b32.xlu0 %v613_v59, %s1779_s12  ;;  %v619_v61 = vsel %vm614_vm1, %v613_v59, 0 }
 0x27e   : > { %1409 = vmatpush3.bf16.xpose.msra.mxu1 %v619_v61 }
 0x27f   : > { %1414 = vmatprep.subr.bf16.mxu1 %v1776_v3 }
 0x281   : > { %963 = vrot.lane.b32.xlu0 %v613_v59, %s1780_s22 }
 0x285   : > { %1411 = vmatmul.mubr.msk.bf16.vlgmr.msra.gmra.mrb[4].mxu1 %vm614_vm1, %v612_v0 }
 0x286   : > { %1415 = vmatpush3.bf16.msra.mxu1 %v681_v1  ;;  %1416 = vmatprep.mubr.msk.bf16.mxu1 %vm1778_vm0, %v1776_v3 }
 0x287   : > { %1420 = vmatprep.subr.bf16.mxu1 %v1776_v3 }
 0x2ef   : > { %v729_v16 = vpop.permute.xlu0 %728 }
 0x2f0   : > { %v734_v23 = vsel %vm614_vm1, %v729_v16, 0 }
 0x2f3   : > { %v964_v21 = vpop.permute.xlu0 %963 }
 0x2f4   : > { %v969_v25 = vsel %vm614_vm1, %v964_v21, 0  ;;  %v1587_v21 = vld [vmem:[#allocation8 + $0x10] sm:$0xff]  }
 0x358   : > { %v655_v2 = vpop.f32.mrb[4].mxu1 }
 0x359   : > { %v661_v4 = vmul.f32 0.17677669, %v655_v2  ;;  %v1412_v5 = vpop.f32.mrb[5].mxu1 }
 0x35a   : > { %v658_v6 = vpop.f32.mrb[6].mxu1 }
 0x35b   : > { %v1413_v7 = vpop.f32.mrb[7].mxu1  ;;  %v663_v8 = vsel %vm662_vm3, %v661_v4, -inf }
 0x35c   : > { %664 = vmax.xlane.f32.xlu1 %v663_v8 }
 0x3e9   : > { %v665_v9 = vpop.xlane.xlu1 %664 }
 0x3ea   : > { %v666_v10 = vsub.f32 %v661_v4, %v665_v9 }
 0x3ec   : > { %v667_v11 = vmul.f32 1.442695, %v666_v10 }
 0x3ee   : > { %1595 = vpow2.f32 %v667_v11 }
 0x3f8   : > { %v1596_v12 = vpop.eup %1595 }
 0x3f9   : > { %v669_v13 = vsel %vm662_vm3, %v1596_v12, 0.0 }
 0x3fa   : > { %670 = vadd.xlane.f32.xlu1 %v669_v13 }
 0x40b   : > { %725 = vrot.lane.b32.xlu1 %v612_v0, %s1779_s12 }
 0x40f   : > { %846 = vrot.lane.b32.xlu1 %v613_v59, %s1781_s16 }
 0x413   : > { %844 = vrot.lane.b32.xlu1 %v612_v0, %s1781_s16 }
 0x417   : > { %961 = vrot.lane.b32.xlu1 %v612_v0, %s1780_s22 }
 0x487   : > { %v671_v14 = vpop.xlane.xlu1 %670 }
 0x488   : > { %1597 = vrcp.f32 %v671_v14 }
 0x48b   : > { %v726_v15 = vpop.permute.xlu1 %725 }
 0x48f   : > { %v847_v17 = vpop.permute.xlu1 %846 }
 0x490   : > { %v852_v18 = vsel %vm614_vm1, %v847_v17, 0 }
 0x491   : > { %1433 = vmatpush3.bf16.xpose.msra.mxu0 %v852_v18 }
 0x492   : > { %v1598_v19 = vpop.eup %1597  ;;  %1444 = vmatprep.subr.bf16.mxu0 %v1776_v3 }
 0x493   : > { %v673_v20 = vmul.f32 %v1598_v19, %v1596_v12  ;;  %v845_v24 = vpop.permute.xlu1 %844  ;;  %v1585_v19 = vld [vmem:[#allocation8] sm:$0xff]  }
 0x495   : > { %v674_v22 = vpack.c.bf16 %v673_v20, %v673_v20  ;;  %v1586_v20 = vld [vmem:[#allocation8 + $0x8] sm:$0xff]  }
 0x497   : > { %1417 = vmatmul.mubr.msk.bf16.vlgmr.msra.gmra.mrb[8].mxu1 %vm662_vm3, %v674_v22  ;;  %v962_v26 = vpop.permute.xlu1 %961  ;;  %v1588_v22 = vld [vmem:[#allocation8 + $0x18] sm:$0xff]  }
 0x498   : > { %1421 = vmatpush3.bf16.xpose.msra.mxu1 %v734_v23  ;;  %1435 = vmatmul.mubr.msk.bf16.vlgmr.msra.gmra.mrb[4].mxu0 %vm614_vm1, %v845_v24  ;;  %v1589_v23 = vld [vmem:[#allocation8 + $0x20] sm:$0xff]   ;;  %v1590_v24 = vld [vmem:[#allocation8 + $0x28] sm:$0xff]  }
 0x499   : > { %1445 = vmatpush3.bf16.xpose.msra.mxu0 %v969_v25  ;;  %1422 = vmatprep.mubr.msk.bf16.mxu1 %vm1778_vm0, %v1776_v3 }
 0x49a   : > { %1446 = vmatprep.mubr.msk.bf16.mxu0 %vm1778_vm0, %v1776_v3  ;;  %1426 = vmatprep.subr.bf16.mxu1 %v1776_v3 }
 0x49b   : > { %1456 = vmatprep.subr.bf16.mxu0 %v1776_v3 }
 0x49f   : > { %1423 = vmatmul.mubr.msk.bf16.vlgmr.msra.gmra.mrb[12].mxu1 %vm614_vm1, %v726_v15 }
 0x4a0   : > { %1447 = vmatmul.mubr.msk.bf16.vlgmr.msra.gmra.mrb[8].mxu0 %vm614_vm1, %v962_v26  ;;  %1428 = vmatprep.mubr.msk.bf16.mxu1 %vm1778_vm0, %v1776_v3 }
 0x4a1   : > { %1472 = vmatprep.mubr.msk.bf16.mxu0 %vm1778_vm0, %v1776_v3  ;;  %1457 = vmatpush3.bf16.msra.mxu0 %v1585_v19 }
 0x4a2   : > { %1458 = vmatprep.subr.bf16.mxu0 %v1776_v3 }
 0x4a5   : > { %1459 = vmatpush3.bf16.msra.mxu0 %v1586_v20 }
 0x4a6   : > { %1460 = vmatprep.subr.bf16.mxu0 %v1776_v3 }
 0x4a9   : > { %1461 = vmatpush3.bf16.msra.mxu0 %v1587_v21 }
 0x4aa   : > { %1462 = vmatprep.subr.bf16.mxu0 %v1776_v3 }
 0x4ad   : > { %1463 = vmatpush3.bf16.msra.mxu0 %v1588_v22 }
 0x4ae   : > { %1464 = vmatprep.subr.bf16.mxu0 %v1776_v3 }
 0x4b1   : > { %1465 = vmatpush3.bf16.msra.mxu0 %v1589_v23 }
 0x4b2   : > { %1466 = vmatprep.subr.bf16.mxu0 %v1776_v3 }
 0x4b5   : > { %1467 = vmatpush3.bf16.msra.mxu0 %v1590_v24 }
 0x4b6   : > { %1468 = vmatprep.subr.bf16.mxu0 %v1776_v3 }
 0x56a   : > { %v717_v27 = vpop.f32.mrb[8].mxu1 }
 0x56b   : > { %723 = vst.msk [vmem:[#allocation2] sm:$0xff] %vm614_vm1, %v717_v27  ;;  %v1418_v28 = vpop.f32.mrb[9].mxu1  ;;  %v888_v29 = vpop.f32.mrb[4].mxu0 }
 0x56c   : > { %v894_v30 = vmul.f32 0.17677669, %v888_v29  ;;  %v720_v31 = vpop.f32.mrb[10].mxu1  ;;  %v1436_v32 = vpop.f32.mrb[5].mxu0  ;;  %v1591_v29 = vld [vmem:[#allocation8 + $0x30] sm:$0xff]  }
 0x56d   : > { %v1419_v33 = vpop.f32.mrb[11].mxu1  ;;  %v891_v34 = vpop.f32.mrb[6].mxu0  ;;  %1469 = vmatpush3.bf16.msra.mxu0 %v1591_v29 }
 0x56e   : > { %v1437_v35 = vpop.f32.mrb[7].mxu0  ;;  %v895_v36 = vsel %vm662_vm3, %v894_v30, -inf  ;;  %1470 = vmatprep.subr.bf16.mxu0 %v1776_v3 }
 0x56f   : > { %896 = vmax.xlane.f32.xlu1 %v895_v36 }
 0x572   : > { %v770_v37 = vpop.f32.mrb[12].mxu1 }
 0x573   : > { %v776_v38 = vmul.f32 0.17677669, %v770_v37  ;;  %v1424_v39 = vpop.f32.mrb[13].mxu1  ;;  %v1005_v40 = vpop.f32.mrb[8].mxu0 }
 0x574   : > { %v773_v41 = vpop.f32.mrb[14].mxu1  ;;  %v1448_v42 = vpop.f32.mrb[9].mxu0  ;;  %v1011_v43 = vmul.f32 0.17677669, %v1005_v40 }
 0x575   : > { %v1425_v44 = vpop.f32.mrb[15].mxu1  ;;  %v1008_v45 = vpop.f32.mrb[10].mxu0  ;;  %v777_v46 = vsel %vm662_vm3, %v776_v38, -inf }
 0x576   : > { %v1449_v47 = vpop.f32.mrb[11].mxu0  ;;  %778 = vmax.xlane.f32.xlu0 %v777_v46  ;;  %v1012_v48 = vsel %vm662_vm3, %v1011_v43, -inf }
 0x57a   : > { %1013 = vmax.xlane.f32.xlu0 %v1012_v48 }
 0x5fc   : > { %v897_v49 = vpop.xlane.xlu1 %896 }
 0x5fd   : > { %v898_v50 = vsub.f32 %v894_v30, %v897_v49  ;;  %v1592_v30 = vld [vmem:[#allocation8 + $0x38] sm:$0xff]  }
 0x5fe   : > { %1471 = vmatpush3.bf16.msra.mxu0 %v1592_v30 }
 0x5ff   : > { %v899_v51 = vmul.f32 1.442695, %v898_v50 }
 0x601   : > { %1599 = vpow2.f32 %v899_v51 }
 0x603   : > { %v779_v52 = vpop.xlane.xlu0 %778 }
 0x604   : > { %v780_v53 = vsub.f32 %v776_v38, %v779_v52 }
 0x606   : > { %v781_v54 = vmul.f32 1.442695, %v780_v53 }
 0x607   : > { %v1014_v55 = vpop.xlane.xlu0 %1013 }
 0x608   : > { %1601 = vpow2.f32 %v781_v54  ;;  %v1015_v56 = vsub.f32 %v1011_v43, %v1014_v55  ;;  %v1341_v43 = vld [vmem:[%s2161_s6] ss:$0 sm:$0xff] }
 0x60a   : > { %v1016_v57 = vmul.f32 1.442695, %v1015_v56 }
 0x60b   : > { %v1600_v58 = vpop.eup %1599 }
 0x60c   : > { %1603 = vpow2.f32 %v1016_v57  ;;  %v901_v59 = vsel %vm662_vm3, %v1600_v58, 0.0 }
 0x60d   : > { %902 = vadd.xlane.f32.xlu0 %v901_v59 }
 0x612   : > { %v1602_v60 = vpop.eup %1601 }
 0x613   : > { %v783_v61 = vsel %vm662_vm3, %v1602_v60, 0.0 }
 0x614   : > { %784 = vadd.xlane.f32.xlu0 %v783_v61 }
 0x616   : > { %v1604_v62 = vpop.eup %1603 }
 0x617   : > { %v1018_v0 = vsel %vm662_vm3, %v1604_v62, 0.0 }
 0x618   : > { %1019 = vadd.xlane.f32.xlu1 %v1018_v0 }
 0x629   : > { %907 = vrot.lane.b32.xlu1 %v2034_v63, %s1781_s16 }
 0x62a   : > { %790 = vrot.lane.b32.xlu0 %v2034_v63, %s1779_s12 }
 0x62d   : > { %1024 = vrot.lane.b32.xlu1 %v2034_v63, %s1780_s22 }
 0x69a   : > { %v903_v1 = vpop.xlane.xlu0 %902 }
 0x6a1   : > { %v785_v2 = vpop.xlane.xlu0 %784 }
 0x6a2   : > { %1605 = vrcp.f32 %v785_v2 }
 0x6a3   : > { %1607 = vrcp.f32 %v903_v1 }
 0x6a5   : > { %v791_v4 = vpop.permute.xlu0 %790  ;;  %v1020_v6 = vpop.xlane.xlu1 %1019 }
 0x6a6   : > { %v796_v5 = vsel %vm679_vm2, %v791_v4, 0  ;;  %1609 = vrcp.f32 %v1020_v6 }
 0x6a7   : > { %1427 = vmatpush3.bf16.msra.mxu1 %v796_v5 }
 0x6a8   : > { %1438 = vmatprep.subr.bf16.mxu1 %v1776_v3 }
 0x6a9   : > { %v908_v9 = vpop.permute.xlu1 %907 }
 0x6aa   : > { %v913_v12 = vsel %vm679_vm2, %v908_v9, 0 }
 0x6ac   : > { %v1606_v7 = vpop.eup %1605 }
 0x6ad   : > { %v787_v8 = vmul.f32 %v1606_v7, %v1602_v60  ;;  %v1608_v11 = vpop.eup %1607  ;;  %v1025_v13 = vpop.permute.xlu1 %1024 }
 0x6ae   : > { %v905_v63 = vmul.f32 %v1608_v11, %v1600_v58  ;;  %v1030_v16 = vsel %vm679_vm2, %v1025_v13, 0 }
 0x6af   : > { %v788_v10 = vpack.c.bf16 %v787_v8, %v787_v8 }
 0x6b0   : > { %v906_v14 = vpack.c.bf16 %v905_v63, %v905_v63  ;;  %v1610_v15 = vpop.eup %1609 }
 0x6b1   : > { %1429 = vmatmul.mubr.msk.bf16.vlgmr.msra.gmra.mrb[16].mxu1 %vm662_vm3, %v788_v10  ;;  %v1022_v17 = vmul.f32 %v1610_v15, %v1604_v62 }
 0x6b2   : > { %1439 = vmatpush3.bf16.msra.mxu1 %v913_v12  ;;  %1440 = vmatprep.mubr.msk.bf16.mxu1 %vm1778_vm0, %v1776_v3 }
 0x6b3   : > { %1450 = vmatprep.subr.bf16.mxu1 %v1776_v3  ;;  %v1023_v18 = vpack.c.bf16 %v1022_v17, %v1022_v17 }
 0x6b9   : > { %1441 = vmatmul.mubr.msk.bf16.vlgmr.msra.gmra.mrb[20].mxu1 %vm662_vm3, %v906_v14 }
 0x6ba   : > { %1451 = vmatpush3.bf16.msra.mxu1 %v1030_v16  ;;  %1452 = vmatprep.mubr.msk.bf16.mxu1 %vm1778_vm0, %v1776_v3 }
 0x6c1   : > { %1453 = vmatmul.mubr.msk.bf16.vlgmr.msra.gmra.mrb[24].mxu1 %vm662_vm3, %v1023_v18 }
 0x784   : > { %v832_v25 = vpop.f32.mrb[16].mxu1 }
 0x785   : > { %839 = vrot.lane.b32.xlu1 %v832_v25, %s1780_s22  ;;  %v1430_v26 = vpop.f32.mrb[17].mxu1 }
 0x786   : > { %v835_v27 = vpop.f32.mrb[18].mxu1 }
 0x787   : > { %v1431_v28 = vpop.f32.mrb[19].mxu1 }
 0x78c   : > { %v949_v31 = vpop.f32.mrb[20].mxu1 }
 0x78d   : > { %956 = vrot.lane.b32.xlu0 %v949_v31, %s1781_s16  ;;  %v1442_v32 = vpop.f32.mrb[21].mxu1 }
 0x78e   : > { %v952_v33 = vpop.f32.mrb[22].mxu1 }
 0x78f   : > { %v1443_v34 = vpop.f32.mrb[23].mxu1 }
 0x794   : > { %v1066_v35 = vpop.f32.mrb[24].mxu1 }
 0x795   : > { %1073 = vrot.lane.b32.xlu1 %v1066_v35, %s1779_s12  ;;  %v1454_v36 = vpop.f32.mrb[25].mxu1  ;;  %s1701_s12 = sshll.u32 %s1782_s14, 4  ;;  %s1702_s12 = int_to_ptr.vmem [resolvable:$false] %s1701_s12 }
 0x796   : > { %v1069_v37 = vpop.f32.mrb[26].mxu1  ;;  %s1703_s22 = scalar_lea.vmem %s1702_s12, 256  ;;  %p1704_p5 = scmp.lt.s32.totalorder %s2113_s9, %s1702_s12 }
 0x797   : > { %v1455_v38 = vpop.f32.mrb[27].mxu1  ;;  %p1705_p9 = scmp.lt.s32.totalorder %s1703_s22, %s1697_s10 }
 0x799   : > { %p1706_p12 = por %p1705_p9, %p1704_p5 }
 0x79b   : > { %p1707_p2 = pnand %p1706_p12, %p1700_p3 }
 0x7f7   : > { %v840_v39 = vpop.permute.xlu1 %839 }
 0x7f8   : > { %843 = vst.msk [vmem:[#allocation2] sm:$0xff] %vm842_vm4, %v840_v39 }
 0x7ff   : > { %v957_v3 = vpop.permute.xlu0 %956 }
 0x800   : > { %960 = vst.msk [vmem:[#allocation2] sm:$0xff] %vm959_vm5, %v957_v3 }
 0x807   : > { %v1074_v40 = vpop.permute.xlu1 %1073 }
 0x808   : > { %1077 = vst.msk [vmem:[#allocation2] sm:$0xff] %vm1076_vm6, %v1074_v40 }
 0x80f   : > { %v1078_v41 = vld [vmem:[#allocation2] sm:$0xff] }
 0x810   : > { %v1079_v42 = vpack.c.bf16 %v1078_v41, %v1078_v41 }
 0x812   : > { %1473 = vmatmul.mubr.bf16.vlgmr.msra.gmra.mrb[12].mxu0 %v1079_v42 }
 0x8e5   : > { %v1185_v44 = vpop.f32.mrb[12].mxu0 }
 0x8e6   : > { %v1186_v45 = vadd.f32 %v1341_v43, %v1185_v44  ;;  %v1474_v46 = vpop.f32.mrb[13].mxu0 }
 0x8e7   : > { %v1188_v47 = vpop.f32.mrb[14].mxu0 }
 0x8e8   : > { %1191 = vst [vmem:[%s322_s30] sm:$0xff] %v1186_v45  ;;  %v1475_v48 = vpop.f32.mrb[15].mxu0 }
 0x8e9   : > { %1710 = shalt.err (!%p1707_p2)
}
 0x8ea   : > { %s1711_s15 = scalar_lea.hbm %s2111_s29, 128  ;;  %s1715_s20 = scalar_lea.hbm %s2162_s7, 256 }
 0x8eb   : > { %p1712_p13 = scmp.ne.s32.totalorder %s2111_s29, %s1711_s15  ;;  %p1716_p4 = scmp.lt.u32.totalorder %s2111_s29, %s2162_s7 }
 0x8ec   : > { %p1717_p7 = scmp.lt.u32.totalorder %s1715_s20, %s1711_s15  ;;  %p1719_p11 = scmp.lt.u32.totalorder %s1711_s15, %s2111_s29 }
 0x8ed   : > { %p1713_p6 = pnand %p1712_p13, %p2176_p0 }
 0x8ee   : > { %p1718_p8 = por %p1717_p7, %p1716_p4 }
 0x8ef   : > { %p1714_p10 = pneg %p1713_p6 }
 0x8f0   : > { %p1720_p1 = por %p1719_p11, %p1718_p8 }
 0x8f2   : > { %p1721_p3 = pnand %p1720_p1, %p1714_p10 }
 0x8f4   : > { %1724 = shalt.err (!%p1721_p3)
}
 0x8f5   : > { %1486 = dma.vmem_to_hbm [thread:$0]  (%p2176_p0), %s2113_s9, 128, %s2111_s29, %s1193_s28  }
 0x8f6 PF: > { %s1218_s11 = sand.u32 1, %s1755_s24   ;;  %p2177_p5 = scmp.ne.s32.totalorder %s2167_s8, 0 }
 0x8f7   : > { %p2178_p9 = scmp.ge.s32.totalorder %s1767_s27, 2  ;;  %s1219_s23 = scalar_lea.sflag [#allocation5], %s1218_s11 }
 0x8f9   : > { %p1500_p12 = pnand %p2178_p9, %p2177_p5 }
 0x8fb   : > { %1750 = dma.done.wait (!%p1500_p12), %s1219_s23, 128  }
 0x8fc   : > { %1752 = vsyncadd (!%p1500_p12), %s1219_s23, 4294967168  ;;  %p21_p2 = scmp.ge.s32.totalorder %s1933_s13, 4   ;;  %s2179_s24 = smov %s1759_s25 }
 0x8fd   : > { %s2180_s25 = smov %s1763_s26  ;;  %s2181_s26 = smov %s1942_s17 }
 0x8fe   : > { %s2182_s27 = smov %s1933_s13  ;;  %23 = sbr.rel (!%p21_p2) target bundleno = 6 (0x6), region = 101 }
 0x905   :  { %1224 = vsyncpa [#allocation4], 1 }
 0x906   :  { %1226 = vsyncpa [#allocation4 + $0x1], 1 }
 0x907   :  { %1227 = vsyncpa [#allocation7], 1 }
 0x908   :  { %1228 = vsyncpa [#allocation5], 1 }
 0x909   :  { %1230 = vsyncpa [#allocation5 + $0x1], 1 }

</bundles_post_ra>
